<compile_context>
chip_gen: v5e
topology: v5e:2x2
jax: 0.10.0
libtpu: 0.0.40
codegen_flags: <defaults>
</compile_context>

<pallas_src>
import functools

import jax
import jax.numpy as jnp
from jax.experimental import pallas as pl
from jax.experimental.pallas import tpu as pltpu


# ---------------------------------------------------------------------------
# Hardware-budget helpers
# ---------------------------------------------------------------------------
def _vmem_capacity_bytes():
    try:
        return int(pltpu.get_tpu_info().vmem_capacity_bytes)
    except Exception:
        return 64 << 20  # conservative (v7x per-TC capacity)


def _small_limit_bytes():
    # Gridless single-block path: whole problem resident in VMEM once.
    # v5e/v6e (128 MiB) -> 12 MiB threshold; v7x (64 MiB) -> 8 MiB (lower, so
    # larger batches hit the parallel grid and use both TensorCores).
    return min(_vmem_capacity_bytes() // 8, 12 << 20)


def _tiled_vmem_limit_bytes():
    # 2 inputs x 2 pipeline buffers x ~4 MiB blocks + outputs, with headroom.
    return min(_vmem_capacity_bytes() // 2, 32 << 20)


def _auto_tile_rows(row_bytes, n):
    target_block = min(_vmem_capacity_bytes() // 16, 4 << 20)
    rows = target_block // max(int(row_bytes), 1)
    rows = max(256, min(rows, 4096))
    rows = min(rows, ((n + 7) // 8) * 8)
    return max(8, (rows // 8) * 8)


# ---------------------------------------------------------------------------
# Cross-entropy kernels (inputs: logits [rows, C], class idx [rows, 1] int32)
# ---------------------------------------------------------------------------
def _ce_rowwise(logits, cls):
    """Per-row (picked_logit, logsumexp), both [rows, 1] float32."""
    col = jax.lax.broadcasted_iota(jnp.int32, logits.shape, 1)
    picked = jnp.sum(jnp.where(col == cls, logits, 0.0), axis=1, keepdims=True)
    m = jnp.max(logits, axis=1, keepdims=True)
    lse = m + jnp.log(jnp.sum(jnp.exp(logits - m), axis=1, keepdims=True))
    return picked, lse


def _ce_small_kernel(logits_ref, cls_ref, out_ref):
    logits = logits_ref[...].astype(jnp.float32)      # [N, C], upcast in vregs
    cls = cls_ref[...]                                # [N, 1] int32
    n = logits.shape[0]
    picked, lse = _ce_rowwise(logits, cls)
    out_ref[0] = jnp.sum(lse - picked) / n            # scalar -> SMEM


def _ce_tiled_kernel(logits_ref, cls_ref, out_ref, *, n_valid, tile_n):
    i = pl.program_id(0)
    logits = logits_ref[...].astype(jnp.float32)      # [tile_n, C]
    cls = cls_ref[...]                                # [tile_n, 1]
    picked, lse = _ce_rowwise(logits, cls)
    row = jax.lax.broadcasted_iota(jnp.int32, (tile_n, 1), 0) + i * tile_n
    # Ragged last block: select (not multiply) so garbage rows cannot inject NaN.
    per_row = jnp.where(row < n_valid, lse - picked, 0.0)
    # lane/sublane-dense per-tile partial (unmasked full-vreg store).
    out_ref[...] = jnp.full((1, 8, 128), jnp.sum(per_row), dtype=jnp.float32)


# ---------------------------------------------------------------------------
# BCE kernels (inputs are probabilities; torch BCELoss clamps logs at -100)
# ---------------------------------------------------------------------------
def _bce_elem_ll(p, t):
    log_p = jnp.maximum(jnp.log(p), -100.0)
    log_1mp = jnp.maximum(jnp.log1p(-p), -100.0)
    return t * log_p + (1.0 - t) * log_1mp


def _bce_small_kernel(p_ref, t_ref, out_ref, *, total):
    p = p_ref[...].astype(jnp.float32)                # [N, C]
    t = t_ref[...].astype(jnp.float32)
    out_ref[0] = -jnp.sum(_bce_elem_ll(p, t)) / total  # scalar -> SMEM


def _bce_tiled_kernel(p_ref, t_ref, out_ref, *, n_valid, tile_r):
    i = pl.program_id(0)
    p = p_ref[...].astype(jnp.float32)                # [tile_r, C]
    t = t_ref[...].astype(jnp.float32)
    ll = _bce_elem_ll(p, t)
    row = jax.lax.broadcasted_iota(jnp.int32, p.shape, 0) + i * tile_r
    ll = jnp.where(row < n_valid, ll, 0.0)            # ragged tail: select
    out_ref[...] = jnp.full((1, 8, 128), jnp.sum(ll), dtype=jnp.float32)


# ---------------------------------------------------------------------------
# pallas_call wrappers
# ---------------------------------------------------------------------------
def _small_scalar_call(kernel, a, b, cost):
    """Gridless single-block call, scalar result in SMEM (no pipeline, no grid)."""
    out = pl.pallas_call(
        kernel,
        out_shape=jax.ShapeDtypeStruct((1,), jnp.float32),
        in_specs=[pl.BlockSpec(memory_space=pltpu.VMEM),
                  pl.BlockSpec(memory_space=pltpu.VMEM)],
        out_specs=pl.BlockSpec(memory_space=pltpu.SMEM),
        cost_estimate=cost,
    )(a, b)
    return out[0]


def _tiled_partial_call(kernel, args, in_specs, num_tiles, cost):
    """Row-tiled call; per-tile partial sums on a 'parallel' grid axis."""
    partials = pl.pallas_call(
        kernel,
        out_shape=jax.ShapeDtypeStruct((num_tiles, 8, 128), jnp.float32),
        grid=(num_tiles,),
        in_specs=in_specs,
        out_specs=pl.BlockSpec((1, 8, 128), lambda i: (i, 0, 0)),
        compiler_params=pltpu.CompilerParams(
            dimension_semantics=("parallel",),
            vmem_limit_bytes=_tiled_vmem_limit_bytes()),
        cost_estimate=cost,
    )(*args)
    return partials[:, 0, 0]


# ---------------------------------------------------------------------------
# Loss entry points
# ---------------------------------------------------------------------------
def _ce_loss(logits, target, force_tile_rows=None):
    n, c = logits.shape
    # Exact torch semantics: target.argmax(1).long(); only N*4 bytes reach the
    # kernel instead of the full N*C one-hot matrix.
    cls = jnp.argmax(target, axis=1).astype(jnp.int32).reshape(n, 1)
    itemsize = jnp.dtype(logits.dtype).itemsize
    in_bytes = n * c * itemsize + n * 4
    cost = pl.CostEstimate(flops=6 * n * c, transcendentals=n * c,
                           bytes_accessed=in_bytes + 4)

    if force_tile_rows is None and in_bytes <= _small_limit_bytes():
        return _small_scalar_call(_ce_small_kernel, logits, cls, cost)

    if force_tile_rows is not None:
        tile_rows = max(8, (int(force_tile_rows) // 8) * 8)
        tile_rows = min(tile_rows, ((n + 7) // 8) * 8)
    else:
        tile_rows = _auto_tile_rows(c * itemsize, n)
    num_tiles = pl.cdiv(n, tile_rows)
    kernel = functools.partial(_ce_tiled_kernel, n_valid=n, tile_n=tile_rows)
    in_specs = [pl.BlockSpec((tile_rows, c), lambda i: (i, 0)),
                pl.BlockSpec((tile_rows, 1), lambda i: (i, 0))]
    partials = _tiled_partial_call(kernel, (logits, cls), in_specs, num_tiles, cost)
    return jnp.sum(partials) / n


def _bce_loss(proba, target, force_tile_rows=None):
    n, c = proba.shape
    if not jnp.issubdtype(target.dtype, jnp.floating):
        target = target.astype(jnp.float32)     # torch: target.float()
    total = n * c
    pbytes = jnp.dtype(proba.dtype).itemsize
    tbytes = jnp.dtype(target.dtype).itemsize
    in_bytes = n * c * (pbytes + tbytes)
    cost = pl.CostEstimate(flops=4 * total, transcendentals=2 * total,
                           bytes_accessed=in_bytes + 4)

    if force_tile_rows is None and in_bytes <= _small_limit_bytes():
        kernel = functools.partial(_bce_small_kernel, total=total)
        return _small_scalar_call(kernel, proba, target, cost)

    if force_tile_rows is not None:
        tile_rows = max(8, (int(force_tile_rows) // 8) * 8)
        tile_rows = min(tile_rows, ((n + 7) // 8) * 8)
    else:
        tile_rows = _auto_tile_rows(c * (pbytes + tbytes), n)
    num_tiles = pl.cdiv(n, tile_rows)
    kernel = functools.partial(_bce_tiled_kernel, n_valid=n, tile_r=tile_rows)
    in_specs = [pl.BlockSpec((tile_rows, c), lambda i: (i, 0)),
                pl.BlockSpec((tile_rows, c), lambda i: (i, 0))]
    partials = _tiled_partial_call(kernel, (proba, target), in_specs, num_tiles, cost)
    return -jnp.sum(partials) / total


def resnet_loss(input_dict, target, loss_type="ce", *, force_tile_rows=None):
    """JAX/Pallas equivalent of ResNetLoss.forward.

    force_tile_rows: test/tuning knob; forces the row-tiled grid path with the
    given tile height (normally auto-dispatched on a VMEM-budget check).
    """
    if loss_type == "ce":
        return _ce_loss(input_dict["multiclass_proba"], target, force_tile_rows)
    elif loss_type == "bce":
        return _bce_loss(input_dict["multilabel_proba"], target, force_tile_rows)
    else:
        raise ValueError(f"unknown loss_type: {loss_type}")


if __name__ == "__main__":
    key = jax.random.PRNGKey(0)
    ks = jax.random.split(key, 10)

    # ---------------- small CE (one-hot target) ----------------
    N, C = 8, 32
    logits = jax.random.normal(ks[0], (N, C), dtype=jnp.float32)
    cls = jax.random.randint(ks[1], (N,), 0, C)
    onehot = jax.nn.one_hot(cls, C, dtype=jnp.float32)
    ce = jax.block_until_ready(
        resnet_loss({"multiclass_proba": logits}, onehot, loss_type="ce"))
    ref_ce = jnp.mean(
        jax.nn.logsumexp(logits, axis=1)
        - jnp.take_along_axis(logits, cls[:, None], axis=1)[:, 0])
    assert jnp.allclose(ce, ref_ce, atol=1e-5), (ce, ref_ce)

    # ---------------- small CE, bf16 logits (native-dtype path) ----------------
    logits_bf = logits.astype(jnp.bfloat16)
    ce_bf = jax.block_until_ready(
        resnet_loss({"multiclass_proba": logits_bf}, onehot, loss_type="ce"))
    lf = logits_bf.astype(jnp.float32)
    ref_bf = jnp.mean(
        jax.nn.logsumexp(lf, axis=1)
        - jnp.take_along_axis(lf, cls[:, None], axis=1)[:, 0])
    assert jnp.allclose(ce_bf, ref_bf, atol=1e-3), (ce_bf, ref_bf)

    # ---------------- small CE, soft target (exact argmax semantics) ----------------
    soft = jax.random.uniform(ks[2], (N, C), dtype=jnp.float32)
    ce2 = jax.block_until_ready(
        resnet_loss({"multiclass_proba": logits}, soft, loss_type="ce"))
    cls_soft = jnp.argmax(soft, axis=1)
    ref_ce2 = jnp.mean(
        jax.nn.logsumexp(logits, axis=1)
        - jnp.take_along_axis(logits, cls_soft[:, None], axis=1)[:, 0])
    assert jnp.allclose(ce2, ref_ce2, atol=1e-5), (ce2, ref_ce2)

    # ---------------- small BCE ----------------
    proba = jax.nn.sigmoid(jax.random.normal(ks[3], (N, C), dtype=jnp.float32))
    multilabel = (jax.random.uniform(ks[4], (N, C)) > 0.5).astype(jnp.float32)
    bce = jax.block_until_ready(
        resnet_loss({"multilabel_proba": proba}, multilabel, loss_type="bce"))
    ref_bce = -jnp.mean(multilabel * jnp.log(proba)
                        + (1.0 - multilabel) * jnp.log1p(-proba))
    assert jnp.allclose(bce, ref_bce, atol=1e-5), (bce, ref_bce)

    # ------------- tiled CE path (multi-tile grid + ragged masked tail) -------------
    N2, C2 = 520, 80
    logits2 = jax.random.normal(ks[5], (N2, C2), dtype=jnp.float32)
    cls2 = jax.random.randint(ks[6], (N2,), 0, C2)
    onehot2 = jax.nn.one_hot(cls2, C2, dtype=jnp.float32)
    ce3 = jax.block_until_ready(
        resnet_loss({"multiclass_proba": logits2}, onehot2, loss_type="ce",
                    force_tile_rows=128))
    ref_ce3 = jnp.mean(
        jax.nn.logsumexp(logits2, axis=1)
        - jnp.take_along_axis(logits2, cls2[:, None], axis=1)[:, 0])
    assert jnp.allclose(ce3, ref_ce3, atol=1e-4), (ce3, ref_ce3)

    # ------------- tiled BCE path (multi-tile grid + ragged masked tail) -------------
    N3, C3 = 300, 96
    proba2 = jax.nn.sigmoid(jax.random.normal(ks[7], (N3, C3), dtype=jnp.float32))
    multilabel2 = (proba2 > 0.5).astype(jnp.float32)
    bce2 = jax.block_until_ready(
        resnet_loss({"multilabel_proba": proba2}, multilabel2, loss_type="bce",
                    force_tile_rows=64))
    ref_bce2 = -jnp.mean(multilabel2 * jnp.log(proba2)
                         + (1.0 - multilabel2) * jnp.log1p(-proba2))
    assert jnp.allclose(bce2, ref_bce2, atol=1e-5), (bce2, ref_bce2)

    print("KERNEL_OK")
</pallas_src>

<mosaic_0001>
module attributes {stable_mosaic.version = 11 : i64} {
  func.func @_ce_small_kernel(%arg0: memref<8x32xf32, #tpu.memory_space<vmem>>, %arg1: memref<8x1xi32, #tpu.memory_space<vmem>>, %arg2: memref<1xf32, #tpu.memory_space<smem>>) attributes {dimension_semantics = [], scalar_prefetch = 0 : i64, scratch_operands = 0 : i64, tpu.core_type = #tpu.core_type<tc>} {
    %c0 = arith.constant 0 : index
    %c0_0 = arith.constant 0 : index
    %0 = vector.load %arg0[%c0, %c0_0] : memref<8x32xf32, #tpu.memory_space<vmem>>, vector<8x32xf32>
    %c0_1 = arith.constant 0 : index
    %c0_2 = arith.constant 0 : index
    %1 = vector.load %arg1[%c0_1, %c0_2] : memref<8x1xi32, #tpu.memory_space<vmem>>, vector<8x1xi32>
    %2 = tpu.iota {dimensions = array<i32: 1>} : vector<8x32xi32>
    %3 = vector.broadcast %1 : vector<8x1xi32> to vector<8x32xi32>
    %4 = arith.cmpi eq, %2, %3 : vector<8x32xi32>
    %cst = arith.constant 0.000000e+00 : f32
    %5 = vector.broadcast %cst : f32 to vector<8x32xf32>
    %6 = arith.select %4, %0, %5 : vector<8x32xi1>, vector<8x32xf32>
    %cst_3 = arith.constant dense<0.000000e+00> : vector<8xf32>
    %7 = vector.multi_reduction <add>, %6, %cst_3 [1] : vector<8x32xf32> to vector<8xf32>
    %8 = vector.shape_cast %7 : vector<8xf32> to vector<8x1xf32>
    %cst_4 = arith.constant dense<0xFF800000> : vector<8xf32>
    %9 = vector.multi_reduction <maximumf>, %0, %cst_4 [1] : vector<8x32xf32> to vector<8xf32>
    %10 = vector.shape_cast %9 : vector<8xf32> to vector<8x1xf32>
    %11 = vector.broadcast %10 : vector<8x1xf32> to vector<8x32xf32>
    %12 = arith.subf %0, %11 : vector<8x32xf32>
    %13 = math.exp %12 : vector<8x32xf32>
    %cst_5 = arith.constant dense<0.000000e+00> : vector<8xf32>
    %14 = vector.multi_reduction <add>, %13, %cst_5 [1] : vector<8x32xf32> to vector<8xf32>
    %15 = vector.shape_cast %14 : vector<8xf32> to vector<8x1xf32>
    %16 = math.log %15 : vector<8x1xf32>
    %17 = arith.addf %10, %16 : vector<8x1xf32>
    %18 = arith.subf %17, %8 : vector<8x1xf32>
    %19 = vector.shape_cast %18 : vector<8x1xf32> to vector<1x8x1xf32>
    %cst_6 = arith.constant dense<0.000000e+00> : vector<1xf32>
    %20 = vector.multi_reduction <add>, %19, %cst_6 [1, 2] : vector<1x8x1xf32> to vector<1xf32>
    %21 = vector.shape_cast %20 : vector<1xf32> to vector<1x1x1xf32>
    %22 = vector.extract %21[0, 0, 0] : f32 from vector<1x1x1xf32>
    %cst_7 = arith.constant 8.000000e+00 : f32
    %23 = arith.divf %22, %cst_7 : f32
    %c0_8 = arith.constant 0 : index
    %24 = memref.load %arg2[%c0_8] : memref<1xf32, #tpu.memory_space<smem>>
    memref.store %23, %arg2[%c0_8] : memref<1xf32, #tpu.memory_space<smem>>
    return
  }
}

</mosaic_0001>

<bundles_post_ra>
// kernel: tpu_custom_call.1
= control target key start
LH: loop header
LB: loop body
LE: loop exit
PB: predicated region body
PF: predicated region fallthrough
CT: control target
= control target key end

     0   :  { %vm21_vm0 = vcmask 261120   ;;  %s133_s0 = inlined_call_operand.vmem [shape: f32[8,32], index: 0, kind: input, shape index: {}]   ;;  %s134_s1 = inlined_call_operand.vmem [shape: s32[8,1], index: 1, kind: input, shape index: {}]   ;;  %s135_s2 = inlined_call_operand.hbm [shape: f32[1], index: 2, kind: output, shape index: {}]  }
   0x1   :  { %v12_v0 = vld [vmem:[%s133_s0] sm:$0xff] }
   0x2   :  { %7 = vsyncpa [#allocation3], 0  ;;  %v25_v1 = vsel %vm21_vm0, %v12_v0, -inf  ;;  %v103_v2 = vmov 0   ;;  %v13_v3 = vld [vmem:[%s134_s1] sm:$0xff]  ;;  %v14_v9 = vlaneseq  ;;  %vm38_vm2 = vcmask 7168  }
   0x3   :  { %82 = vset.pattern.permute.xlu0 %v103_v2  ;;  %v104_v21 = vmov 8.0   ;;  %s65_s13 = sshll.u32 %s135_s2, 4  ;;  %s105_s17 = smov [#allocation2]   ;;  %s66_s13 = int_to_ptr.hbm [resolvable:$true] %s65_s13 }
   0x4   :  { %26 = vmax.xlane.f32.xlu0 %v25_v1  ;;  %v15_v10 = vand.u32 127, %v14_v9 }
  0x18   :  { %17 = vperm.xlu0 %82, %v13_v3  }
  0x77   :  { %v27_v4 = vpop.xlane.xlu0 %26 }
  0x78   :  { %v28_v5 = vsub.f32 %v12_v0, %v27_v4 }
  0x7a   :  { %v29_v6 = vmul.f32 1.442695, %v28_v5 }
  0x7c   :  { %83 = vpow2.f32 %v29_v6 }
  0x82   :  { %v84_v7 = vpop.eup %83 }
  0x83   :  { %v31_v8 = vsel %vm21_vm0, %v84_v7, 0.0 }
  0x84   :  { %32 = vadd.xlane.f32.xlu1 %v31_v8 }
  0x8a   :  { %v18_v11 = vpop.permute.xlu0 %17 }
  0x8b   :  { %vm19_vm1 = vcmp.eq.s32.totalorder %v15_v10, %v18_v11 }
  0x8c   :  { %v20_v12 = vsel %vm19_vm1, %v12_v0, 0.0 }
  0x8d   :  { %v22_v13 = vsel %vm21_vm0, %v20_v12, 0.0 }
  0x8e   :  { %23 = vadd.xlane.f32.xlu1 %v22_v13 }
  0xf7   :  { %v33_v14 = vpop.xlane.xlu1 %32 }
  0xf8   :  { %85 = vlog2.f32 %v33_v14 }
  0xf9   :  { %87 = vrcp.f32 %v104_v21 }
  0xfe   :  { %v86_v15 = vpop.eup %85 }
  0xff   :  { %v35_v16 = vmul.f32 0.6931472, %v86_v15  ;;  %v88_v22 = vpop.eup %87 }
 0x100   :  { %v50_v23 = vmul.f32 8.0, %v88_v22  ;;  %vm54_vm3 = vweird.f32 %v88_v22 }
 0x101   :  { %v36_v17 = vadd.f32 %v35_v16, %v27_v4  ;;  %v24_v18 = vpop.xlane.xlu1 %23 }
 0x102   :  { %v51_v24 = vsub.f32 1.0, %v50_v23 }
 0x103   :  { %v37_v19 = vsub.f32 %v36_v17, %v24_v18 }
 0x104   :  { %v52_v28 = vmul.f32 %v88_v22, %v51_v24 }
 0x105   :  { %v39_v20 = vsel %vm38_vm2, %v37_v19, 0.0 }
 0x106   :  { %40 = vadd.xlane.f32.xlu2 %v39_v20  ;;  %v53_v31 = vadd.f32 %v88_v22, %v52_v28 }
 0x108   :  { %v55_v34 = vsel %vm54_vm3, %v88_v22, %v53_v31 }
 0x179   :  { %v41_v25 = vpop.xlane.xlu2 %40 }
 0x17a   :  { %v42_v26 = vrot.slane %v41_v25, 4 }
 0x17c   :  { %v43_v27 = vadd.f32 %v42_v26, %v41_v25 }
 0x17e   :  { %v44_v29 = vrot.slane %v43_v27, 2 }
 0x180   :  { %v45_v30 = vadd.f32 %v44_v29, %v43_v27 }
 0x182   :  { %v46_v32 = vrot.slane %v45_v30, 1 }
 0x184   :  { %v47_v33 = vadd.f32 %v46_v32, %v45_v30 }
 0x186   :  { %75 = vpush %v47_v33 }
 0x187   :  { %77 = vpush %v55_v34 }
 0x1b7   :  { %s76_s14 = spop %75 }
 0x1b8   :  { %s78_s15 = spop %77 }
 0x1b9   :  { %s57_s16 = smul.f32 %s78_s15, %s76_s14 }
 0x1bb   :  { %59 = sst [smem:[#allocation2]] %s57_s16 }
 0x1bc   :  { %68 = dma.smem_to_hbm %s105_s17, 16, %s66_s13, [#allocation3]  }
 0x1bd   :  { %101 = dma.done.wait [#allocation3], 16  }
 0x1be   :  { %102 = vsyncadd [#allocation3], 4294967280 }
 0x1bf   :  { %73 = sfence }
 0x1c0   :  { %74 = vsyncpa [#allocation3], 1 }

</bundles_post_ra>
